<compile_context>
chip_gen: v7x
topology: tpu7x:2x2x1
jax: 0.10.0
libtpu: 0.0.40
codegen_flags: <defaults>
</compile_context>

<pallas_src>
import functools

import jax
import jax.numpy as jnp
from jax.experimental import pallas as pl
from jax.experimental.pallas import tpu as pltpu


def bio_mha_kernel(xq_ref, xkv_ref, wq_ref, bq_ref, wk_ref, bk_ref, wv_ref,
                   bv_ref, w1_ref, b1_ref, w2_ref, b2_ref, wo_ref, bo_ref,
                   scal_ref, o_ref, acc_ref, *, num_heads, head_dim):
    """Fused biological multi-head attention for one (batch, query-tile) step.

    xq_ref : (1, Tq, E) VMEM  query rows of this tile (Q / neuromod input)
    xkv_ref: (1, S,  E) VMEM  full sequence (self-attention K / V source)
    w*_ref : bf16 weights (in, out) + f32 biases (1, out) in VMEM
    scal_ref: (3,) SMEM -> [nt_factor, attention_scale, attention_bias]
              nt_factor = (dopamine + serotonin + norep + ach) / 4
    o_ref  : (1, Tq, E) VMEM  output tile
    acc_ref: (Tq, E) f32 VMEM scratch slab for per-head attention outputs
    """
    xq = xq_ref[0]                        # (Tq, E) f32
    xkv = xkv_ref[0]                      # (S,  E) f32
    xq_b = xq.astype(jnp.bfloat16)
    xkv_b = xkv.astype(jnp.bfloat16)

    scale = head_dim ** -0.5

    # q/k/v projections on the MXU (bf16 operands, f32 accumulation).
    # The 1/sqrt(Dh) factor is folded into q once (Tq*E VALU ops) instead of
    # scaling every (Tq, S) score tile per head.
    q = (jnp.dot(xq_b, wq_ref[...], preferred_element_type=jnp.float32)
         + bq_ref[...]) * scale
    k = jnp.dot(xkv_b, wk_ref[...], preferred_element_type=jnp.float32) + bk_ref[...]
    v = jnp.dot(xkv_b, wv_ref[...], preferred_element_type=jnp.float32) + bv_ref[...]
    qb = q.astype(jnp.bfloat16)
    kb = k.astype(jnp.bfloat16)
    vb = v.astype(jnp.bfloat16)

    # Per-head scaled-dot-product attention, written directly into the
    # lane-contiguous scratch slab (no concat; statically unrolled over heads).
    for h in range(num_heads):
        lo = h * head_dim
        qh = qb[:, lo:lo + head_dim]      # (Tq, Dh)
        kh = kb[:, lo:lo + head_dim]      # (S,  Dh)
        vh = vb[:, lo:lo + head_dim]      # (S,  Dh)

        # Contract last dims of both operands -> no kh transpose materialized.
        s = jax.lax.dot_general(qh, kh, (((1,), (1,)), ((), ())),
                                preferred_element_type=jnp.float32)   # (Tq, S)
        s = s - jnp.max(s, axis=-1, keepdims=True)
        p = jnp.exp(s)
        p = p * pl.reciprocal(jnp.sum(p, axis=-1, keepdims=True), approx=True)
        # TODO(synk): dropout_layer is identity in eval mode; no RNG dropout.

        acc_ref[:, lo:lo + head_dim] = jnp.dot(
            p.astype(jnp.bfloat16), vh, preferred_element_type=jnp.float32)

    # NeuromodulationSystem: Linear(E, E//4) -> ReLU -> Linear(E//4, E);
    # the four neurotransmitter effects average to mod * nt_factor.
    h1 = jnp.maximum(
        jnp.dot(xq_b, w1_ref[...], preferred_element_type=jnp.float32)
        + b1_ref[...], 0.0)
    mod = jnp.dot(h1.astype(jnp.bfloat16), w2_ref[...],
                  preferred_element_type=jnp.float32) + b2_ref[...]

    nt_factor = scal_ref[0]
    attn_scale = scal_ref[1]
    attn_bias = scal_ref[2]

    # Neuromodulatory gating on the whole (Tq, E) slab at once (elementwise,
    # identical to per-head slicing since the head partition matches).
    attn = (acc_ref[...] * attn_scale + attn_bias) * (1.0 + mod * nt_factor)

    # Output projection.
    out = jnp.dot(attn.astype(jnp.bfloat16), wo_ref[...],
                  preferred_element_type=jnp.float32) + bo_ref[...]
    o_ref[0] = out.astype(o_ref.dtype)


def bio_mha_forward(query, params, num_heads, *, q_tile=None):
    """query: (B, S, E) float32. Returns (B, S, E) float32."""
    B, S, E = query.shape
    head_dim = E // num_heads
    E4 = E // 4

    wq, bq, wk, bk, wv, bv, w1, b1, w2, b2, wo, bo, scalars = params

    # Query-row tiling so the live (Tq, S) score matrix and output slab stay
    # small for long sequences (v7x: 64 MiB VMEM).  Small S -> single tile.
    if q_tile is None:
        q_tile = S
        if S > 512:
            for cand in (512, 256, 128):
                if S % cand == 0 and cand % 8 == 0:
                    q_tile = cand
                    break
    tq = q_tile if (q_tile == S or (S % q_tile == 0 and q_tile % 8 == 0)) else S
    n_qt = S // tq

    def inv(shape):  # grid-invariant (weight / bias) block
        return pl.BlockSpec(shape, lambda b, qi: tuple(0 for _ in shape))

    kernel = functools.partial(bio_mha_kernel, num_heads=num_heads,
                               head_dim=head_dim)

    # Advisory cost estimate: 4x (S,E)x(E,E) projections, the E->E/4->E MLP,
    # and H x (scores + P@V) per batch element.
    flops = int(B * S * E * (9 * E + 4 * S))
    transcendentals = int(B * num_heads * S * S)
    w_bytes = (4 * E * E + 2 * E * E4) * 2 + (5 * E + E4) * 4
    bytes_accessed = int(2 * B * S * E * 4 + w_bytes)

    # Explicit scoped-VMEM budget (v5e default is only 16 MiB); keep below the
    # 64 MiB physical VMEM of a v7x TensorCore.
    act_bytes = (3 * tq * E + S * E) * 4
    vmem_limit = int(min(max(2 * (w_bytes + act_bytes) + (8 << 20), 32 << 20),
                         60 << 20))

    return pl.pallas_call(
        kernel,
        out_shape=jax.ShapeDtypeStruct((B, S, E), jnp.float32),
        grid_spec=pltpu.PrefetchScalarGridSpec(
            num_scalar_prefetch=0,
            grid=(B, n_qt),
            in_specs=[
                pl.BlockSpec((1, tq, E), lambda b, qi: (b, qi, 0)),  # query tile
                pl.BlockSpec((1, S, E), lambda b, qi: (b, 0, 0)),    # full seq (K/V)
                inv((E, E)), inv((1, E)),      # q_proj
                inv((E, E)), inv((1, E)),      # k_proj
                inv((E, E)), inv((1, E)),      # v_proj
                inv((E, E4)), inv((1, E4)),    # neuromod layer 1
                inv((E4, E)), inv((1, E)),     # neuromod layer 2
                inv((E, E)), inv((1, E)),      # out_proj
                pl.BlockSpec(memory_space=pltpu.MemorySpace.SMEM),   # scalars
            ],
            out_specs=pl.BlockSpec((1, tq, E), lambda b, qi: (b, qi, 0)),
            scratch_shapes=[pltpu.VMEM((tq, E), jnp.float32)],
        ),
        compiler_params=pltpu.CompilerParams(
            dimension_semantics=("parallel", "parallel"),
            vmem_limit_bytes=vmem_limit),
        cost_estimate=pl.CostEstimate(flops=flops,
                                      transcendentals=transcendentals,
                                      bytes_accessed=bytes_accessed),
    )(query, query, wq, bq, wk, bk, wv, bv, w1, b1, w2, b2, wo, bo, scalars)


def init_params(key, embed_dim):
    """Deterministic synthetic parameters matching the PyTorch module shapes.

    nn.Linear stores weight (out, in); we pre-transpose to (in, out) and store
    the matmul weights in bf16 (MXU-native) with f32 biases.
    """
    E = embed_dim
    E4 = E // 4
    ks = jax.random.split(key, 6)

    def lin(k, fan_in, fan_out):
        w = (jax.random.normal(k, (fan_in, fan_out), jnp.float32) * 0.05)
        w = w.astype(jnp.bfloat16)
        b = jnp.full((1, fan_out), 0.01, jnp.float32)
        return w, b

    wq, bq = lin(ks[0], E, E)
    wk, bk = lin(ks[1], E, E)
    wv, bv = lin(ks[2], E, E)
    wo, bo = lin(ks[3], E, E)
    w1, b1 = lin(ks[4], E, E4)
    w2, b2 = lin(ks[5], E4, E)

    # Neurotransmitter levels all init to 1.0; attention scale/bias params.
    dopamine = serotonin = norepinephrine = acetylcholine = 1.0
    nt_factor = (dopamine + serotonin + norepinephrine + acetylcholine) / 4.0
    attention_scale = 1.0
    attention_bias = 0.0
    scalars = jnp.array([nt_factor, attention_scale, attention_bias], jnp.float32)

    return (wq, bq, wk, bk, wv, bv, w1, b1, w2, b2, wo, bo, scalars)


def reference_forward(query, params, num_heads):
    """Plain-JAX f32 reference mirroring the PyTorch forward (self-attention)."""
    wq, bq, wk, bk, wv, bv, w1, b1, w2, b2, wo, bo, scalars = params
    f32 = lambda t: t.astype(jnp.float32)
    B, S, E = query.shape
    Dh = E // num_heads
    scale = Dh ** (-0.5)

    q = query @ f32(wq) + bq
    k = query @ f32(wk) + bk
    v = query @ f32(wv) + bv

    def heads(t):  # (B, S, E) -> (B, H, S, Dh)
        return t.reshape(B, S, num_heads, Dh).transpose(0, 2, 1, 3)

    qh, kh, vh = heads(q), heads(k), heads(v)
    aw = jnp.einsum('bhqd,bhkd->bhqk', qh, kh) * scale
    aw = jax.nn.softmax(aw, axis=-1)
    attn = jnp.einsum('bhqk,bhkd->bhqd', aw, vh)

    mod = jnp.maximum(query.reshape(B * S, E) @ f32(w1) + b1, 0.0) @ f32(w2) + b2
    neuromod = (mod * scalars[0]).reshape(B, S, num_heads, Dh).transpose(0, 2, 1, 3)

    attn = attn * scalars[1] + scalars[2]
    attn = attn * (1.0 + neuromod)
    attn = attn.transpose(0, 2, 1, 3).reshape(B, S, E)
    return attn @ f32(wo) + bo


if __name__ == "__main__":
    B, S, E, H = 2, 8, 32, 4

    key = jax.random.PRNGKey(0)
    k_x, k_p = jax.random.split(key)
    query = jax.random.normal(k_x, (B, S, E), jnp.float32)
    params = init_params(k_p, E)

    out = bio_mha_forward(query, params, num_heads=H)
    out = jax.block_until_ready(out)

    ref = reference_forward(query, params, num_heads=H)
    assert out.shape == (B, S, E)
    # bf16 MXU operands (f32 accumulation) -> small rounding vs f32 reference.
    assert jnp.allclose(out, ref, atol=2e-2, rtol=2e-2), "mismatch vs JAX reference"

    print("KERNEL_OK")
</pallas_src>

<mosaic_0001>
module attributes {stable_mosaic.version = 11 : i64} {
  func.func @bio_mha_kernel(%arg0: i32, %arg1: i32, %arg2: memref<1x8x32xf32, #tpu.memory_space<vmem>>, %arg3: memref<1x8x32xf32, #tpu.memory_space<vmem>>, %arg4: memref<32x32xbf16, #tpu.memory_space<vmem>>, %arg5: memref<1x32xf32, #tpu.memory_space<vmem>>, %arg6: memref<32x32xbf16, #tpu.memory_space<vmem>>, %arg7: memref<1x32xf32, #tpu.memory_space<vmem>>, %arg8: memref<32x32xbf16, #tpu.memory_space<vmem>>, %arg9: memref<1x32xf32, #tpu.memory_space<vmem>>, %arg10: memref<32x8xbf16, #tpu.memory_space<vmem>>, %arg11: memref<1x8xf32, #tpu.memory_space<vmem>>, %arg12: memref<8x32xbf16, #tpu.memory_space<vmem>>, %arg13: memref<1x32xf32, #tpu.memory_space<vmem>>, %arg14: memref<32x32xbf16, #tpu.memory_space<vmem>>, %arg15: memref<1x32xf32, #tpu.memory_space<vmem>>, %arg16: memref<3xf32, #tpu.memory_space<smem>>, %arg17: memref<1x8x32xf32, #tpu.memory_space<vmem>>, %arg18: memref<8x32xf32, #tpu.memory_space<vmem>>) attributes {dimension_semantics = [#tpu.dimension_semantics<parallel>, #tpu.dimension_semantics<parallel>], iteration_bounds = array<i64: 2, 1>, scalar_prefetch = 0 : i64, scratch_operands = 1 : i64, tpu.core_type = #tpu.core_type<tc>, window_params = [{transform_indices = @transform_0, window_bounds = array<i64: 1, 8, 32>}, {transform_indices = @transform_1, window_bounds = array<i64: 1, 8, 32>}, {pipeline_mode = #tpu.pipeline_mode<synchronous>, transform_indices = @transform_2, window_bounds = array<i64: 32, 32>}, {pipeline_mode = #tpu.pipeline_mode<synchronous>, transform_indices = @transform_3, window_bounds = array<i64: 1, 32>}, {pipeline_mode = #tpu.pipeline_mode<synchronous>, transform_indices = @transform_4, window_bounds = array<i64: 32, 32>}, {pipeline_mode = #tpu.pipeline_mode<synchronous>, transform_indices = @transform_5, window_bounds = array<i64: 1, 32>}, {pipeline_mode = #tpu.pipeline_mode<synchronous>, transform_indices = @transform_6, window_bounds = array<i64: 32, 32>}, {pipeline_mode = #tpu.pipeline_mode<synchronous>, transform_indices = @transform_7, window_bounds = array<i64: 1, 32>}, {pipeline_mode = #tpu.pipeline_mode<synchronous>, transform_indices = @transform_8, window_bounds = array<i64: 32, 8>}, {pipeline_mode = #tpu.pipeline_mode<synchronous>, transform_indices = @transform_9, window_bounds = array<i64: 1, 8>}, {pipeline_mode = #tpu.pipeline_mode<synchronous>, transform_indices = @transform_10, window_bounds = array<i64: 8, 32>}, {pipeline_mode = #tpu.pipeline_mode<synchronous>, transform_indices = @transform_11, window_bounds = array<i64: 1, 32>}, {pipeline_mode = #tpu.pipeline_mode<synchronous>, transform_indices = @transform_12, window_bounds = array<i64: 32, 32>}, {pipeline_mode = #tpu.pipeline_mode<synchronous>, transform_indices = @transform_13, window_bounds = array<i64: 1, 32>}, {transform_indices = @transform_14, window_bounds = array<i64: 3>}, {transform_indices = @transform_15, window_bounds = array<i64: 1, 8, 32>}]} {
    %c0 = arith.constant 0 : index
    %c0_0 = arith.constant 0 : index
    %c0_1 = arith.constant 0 : index
    %0 = vector.load %arg2[%c0, %c0_0, %c0_1] : memref<1x8x32xf32, #tpu.memory_space<vmem>>, vector<1x8x32xf32>
    %1 = vector.shape_cast %0 : vector<1x8x32xf32> to vector<8x32xf32>
    %c0_2 = arith.constant 0 : index
    %c0_3 = arith.constant 0 : index
    %c0_4 = arith.constant 0 : index
    %2 = vector.load %arg3[%c0_2, %c0_3, %c0_4] : memref<1x8x32xf32, #tpu.memory_space<vmem>>, vector<1x8x32xf32>
    %3 = vector.shape_cast %2 : vector<1x8x32xf32> to vector<8x32xf32>
    %4 = arith.truncf %1 : vector<8x32xf32> to vector<8x32xbf16>
    %5 = arith.truncf %3 : vector<8x32xf32> to vector<8x32xbf16>
    %c0_5 = arith.constant 0 : index
    %c0_6 = arith.constant 0 : index
    %6 = vector.load %arg4[%c0_5, %c0_6] : memref<32x32xbf16, #tpu.memory_space<vmem>>, vector<32x32xbf16>
    %cst = arith.constant dense<0.000000e+00> : vector<8x32xf32>
    %7 = tpu.matmul %4, %6, %cst {dimension_numbers = #tpu.dot_dimension_numbers<[1], [0], [0], [1], [0, 0, 1, 1], [], []>} : vector<8x32xbf16>, vector<32x32xbf16>, vector<8x32xf32> -> vector<8x32xf32>
    %c0_7 = arith.constant 0 : index
    %c0_8 = arith.constant 0 : index
    %8 = vector.load %arg5[%c0_7, %c0_8] : memref<1x32xf32, #tpu.memory_space<vmem>>, vector<1x32xf32>
    %9 = vector.broadcast %8 : vector<1x32xf32> to vector<8x32xf32>
    %10 = arith.addf %7, %9 : vector<8x32xf32>
    %cst_9 = arith.constant 0.353553385 : f32
    %11 = vector.broadcast %cst_9 : f32 to vector<8x32xf32>
    %12 = arith.mulf %10, %11 : vector<8x32xf32>
    %c0_10 = arith.constant 0 : index
    %c0_11 = arith.constant 0 : index
    %13 = vector.load %arg6[%c0_10, %c0_11] : memref<32x32xbf16, #tpu.memory_space<vmem>>, vector<32x32xbf16>
    %cst_12 = arith.constant dense<0.000000e+00> : vector<8x32xf32>
    %14 = tpu.matmul %5, %13, %cst_12 {dimension_numbers = #tpu.dot_dimension_numbers<[1], [0], [0], [1], [0, 0, 1, 1], [], []>} : vector<8x32xbf16>, vector<32x32xbf16>, vector<8x32xf32> -> vector<8x32xf32>
    %c0_13 = arith.constant 0 : index
    %c0_14 = arith.constant 0 : index
    %15 = vector.load %arg7[%c0_13, %c0_14] : memref<1x32xf32, #tpu.memory_space<vmem>>, vector<1x32xf32>
    %16 = vector.broadcast %15 : vector<1x32xf32> to vector<8x32xf32>
    %17 = arith.addf %14, %16 : vector<8x32xf32>
    %c0_15 = arith.constant 0 : index
    %c0_16 = arith.constant 0 : index
    %18 = vector.load %arg8[%c0_15, %c0_16] : memref<32x32xbf16, #tpu.memory_space<vmem>>, vector<32x32xbf16>
    %cst_17 = arith.constant dense<0.000000e+00> : vector<8x32xf32>
    %19 = tpu.matmul %5, %18, %cst_17 {dimension_numbers = #tpu.dot_dimension_numbers<[1], [0], [0], [1], [0, 0, 1, 1], [], []>} : vector<8x32xbf16>, vector<32x32xbf16>, vector<8x32xf32> -> vector<8x32xf32>
    %c0_18 = arith.constant 0 : index
    %c0_19 = arith.constant 0 : index
    %20 = vector.load %arg9[%c0_18, %c0_19] : memref<1x32xf32, #tpu.memory_space<vmem>>, vector<1x32xf32>
    %21 = vector.broadcast %20 : vector<1x32xf32> to vector<8x32xf32>
    %22 = arith.addf %19, %21 : vector<8x32xf32>
    %23 = arith.truncf %12 : vector<8x32xf32> to vector<8x32xbf16>
    %24 = arith.truncf %17 : vector<8x32xf32> to vector<8x32xbf16>
    %25 = arith.truncf %22 : vector<8x32xf32> to vector<8x32xbf16>
    %26 = vector.extract_strided_slice %23 {offsets = [0, 0], sizes = [8, 8], strides = [1, 1]} : vector<8x32xbf16> to vector<8x8xbf16>
    %27 = vector.extract_strided_slice %24 {offsets = [0, 0], sizes = [8, 8], strides = [1, 1]} : vector<8x32xbf16> to vector<8x8xbf16>
    %28 = vector.extract_strided_slice %25 {offsets = [0, 0], sizes = [8, 8], strides = [1, 1]} : vector<8x32xbf16> to vector<8x8xbf16>
    %cst_20 = arith.constant dense<0.000000e+00> : vector<8x8xf32>
    %29 = tpu.matmul %26, %27, %cst_20 {dimension_numbers = #tpu.dot_dimension_numbers<[1], [1], [0], [0], [0, 0, 1, 0], [], []>} : vector<8x8xbf16>, vector<8x8xbf16>, vector<8x8xf32> -> vector<8x8xf32>
    %cst_21 = arith.constant dense<0xFF800000> : vector<8xf32>
    %30 = vector.multi_reduction <maximumf>, %29, %cst_21 [1] : vector<8x8xf32> to vector<8xf32>
    %31 = vector.shape_cast %30 : vector<8xf32> to vector<8x1xf32>
    %32 = vector.broadcast %31 : vector<8x1xf32> to vector<8x8xf32>
    %33 = arith.subf %29, %32 : vector<8x8xf32>
    %34 = math.exp %33 : vector<8x8xf32>
    %cst_22 = arith.constant dense<0.000000e+00> : vector<8xf32>
    %35 = vector.multi_reduction <add>, %34, %cst_22 [1] : vector<8x8xf32> to vector<8xf32>
    %36 = vector.shape_cast %35 : vector<8xf32> to vector<8x1xf32>
    %37 = tpu.reciprocal %36 {approx = true} : vector<8x1xf32> -> vector<8x1xf32>
    %38 = vector.broadcast %37 : vector<8x1xf32> to vector<8x8xf32>
    %39 = arith.mulf %34, %38 : vector<8x8xf32>
    %40 = arith.truncf %39 : vector<8x8xf32> to vector<8x8xbf16>
    %cst_23 = arith.constant dense<0.000000e+00> : vector<8x8xf32>
    %41 = tpu.matmul %40, %28, %cst_23 {dimension_numbers = #tpu.dot_dimension_numbers<[1], [0], [0], [1], [0, 0, 1, 1], [], []>} : vector<8x8xbf16>, vector<8x8xbf16>, vector<8x8xf32> -> vector<8x8xf32>
    %c0_24 = arith.constant 0 : index
    %c0_25 = arith.constant 0 : index
    %42 = vector.load %arg18[%c0_24, %c0_25] : memref<8x32xf32, #tpu.memory_space<vmem>>, vector<8x8xf32>
    tpu.vector_store %arg18[%c0_24, %c0_25], %41 {strides = array<i32>} : memref<8x32xf32, #tpu.memory_space<vmem>>, vector<8x8xf32>,
    %43 = vector.extract_strided_slice %23 {offsets = [0, 8], sizes = [8, 8], strides = [1, 1]} : vector<8x32xbf16> to vector<8x8xbf16>
    %44 = vector.extract_strided_slice %24 {offsets = [0, 8], sizes = [8, 8], strides = [1, 1]} : vector<8x32xbf16> to vector<8x8xbf16>
    %45 = vector.extract_strided_slice %25 {offsets = [0, 8], sizes = [8, 8], strides = [1, 1]} : vector<8x32xbf16> to vector<8x8xbf16>
    %cst_26 = arith.constant dense<0.000000e+00> : vector<8x8xf32>
    %46 = tpu.matmul %43, %44, %cst_26 {dimension_numbers = #tpu.dot_dimension_numbers<[1], [1], [0], [0], [0, 0, 1, 0], [], []>} : vector<8x8xbf16>, vector<8x8xbf16>, vector<8x8xf32> -> vector<8x8xf32>
    %cst_27 = arith.constant dense<0xFF800000> : vector<8xf32>
    %47 = vector.multi_reduction <maximumf>, %46, %cst_27 [1] : vector<8x8xf32> to vector<8xf32>
    %48 = vector.shape_cast %47 : vector<8xf32> to vector<8x1xf32>
    %49 = vector.broadcast %48 : vector<8x1xf32> to vector<8x8xf32>
    %50 = arith.subf %46, %49 : vector<8x8xf32>
    %51 = math.exp %50 : vector<8x8xf32>
    %cst_28 = arith.constant dense<0.000000e+00> : vector<8xf32>
    %52 = vector.multi_reduction <add>, %51, %cst_28 [1] : vector<8x8xf32> to vector<8xf32>
    %53 = vector.shape_cast %52 : vector<8xf32> to vector<8x1xf32>
    %54 = tpu.reciprocal %53 {approx = true} : vector<8x1xf32> -> vector<8x1xf32>
    %55 = vector.broadcast %54 : vector<8x1xf32> to vector<8x8xf32>
    %56 = arith.mulf %51, %55 : vector<8x8xf32>
    %57 = arith.truncf %56 : vector<8x8xf32> to vector<8x8xbf16>
    %cst_29 = arith.constant dense<0.000000e+00> : vector<8x8xf32>
    %58 = tpu.matmul %57, %45, %cst_29 {dimension_numbers = #tpu.dot_dimension_numbers<[1], [0], [0], [1], [0, 0, 1, 1], [], []>} : vector<8x8xbf16>, vector<8x8xbf16>, vector<8x8xf32> -> vector<8x8xf32>
    %c0_30 = arith.constant 0 : index
    %c8 = arith.constant 8 : index
    %59 = vector.load %arg18[%c0_30, %c8] : memref<8x32xf32, #tpu.memory_space<vmem>>, vector<8x8xf32>
    tpu.vector_store %arg18[%c0_30, %c8], %58 {strides = array<i32>} : memref<8x32xf32, #tpu.memory_space<vmem>>, vector<8x8xf32>,
    %60 = vector.extract_strided_slice %23 {offsets = [0, 16], sizes = [8, 8], strides = [1, 1]} : vector<8x32xbf16> to vector<8x8xbf16>
    %61 = vector.extract_strided_slice %24 {offsets = [0, 16], sizes = [8, 8], strides = [1, 1]} : vector<8x32xbf16> to vector<8x8xbf16>
    %62 = vector.extract_strided_slice %25 {offsets = [0, 16], sizes = [8, 8], strides = [1, 1]} : vector<8x32xbf16> to vector<8x8xbf16>
    %cst_31 = arith.constant dense<0.000000e+00> : vector<8x8xf32>
    %63 = tpu.matmul %60, %61, %cst_31 {dimension_numbers = #tpu.dot_dimension_numbers<[1], [1], [0], [0], [0, 0, 1, 0], [], []>} : vector<8x8xbf16>, vector<8x8xbf16>, vector<8x8xf32> -> vector<8x8xf32>
    %cst_32 = arith.constant dense<0xFF800000> : vector<8xf32>
    %64 = vector.multi_reduction <maximumf>, %63, %cst_32 [1] : vector<8x8xf32> to vector<8xf32>
    %65 = vector.shape_cast %64 : vector<8xf32> to vector<8x1xf32>
    %66 = vector.broadcast %65 : vector<8x1xf32> to vector<8x8xf32>
    %67 = arith.subf %63, %66 : vector<8x8xf32>
    %68 = math.exp %67 : vector<8x8xf32>
    %cst_33 = arith.constant dense<0.000000e+00> : vector<8xf32>
    %69 = vector.multi_reduction <add>, %68, %cst_33 [1] : vector<8x8xf32> to vector<8xf32>
    %70 = vector.shape_cast %69 : vector<8xf32> to vector<8x1xf32>
    %71 = tpu.reciprocal %70 {approx = true} : vector<8x1xf32> -> vector<8x1xf32>
    %72 = vector.broadcast %71 : vector<8x1xf32> to vector<8x8xf32>
    %73 = arith.mulf %68, %72 : vector<8x8xf32>
    %74 = arith.truncf %73 : vector<8x8xf32> to vector<8x8xbf16>
    %cst_34 = arith.constant dense<0.000000e+00> : vector<8x8xf32>
    %75 = tpu.matmul %74, %62, %cst_34 {dimension_numbers = #tpu.dot_dimension_numbers<[1], [0], [0], [1], [0, 0, 1, 1], [], []>} : vector<8x8xbf16>, vector<8x8xbf16>, vector<8x8xf32> -> vector<8x8xf32>
    %c0_35 = arith.constant 0 : index
    %c16 = arith.constant 16 : index
    %76 = vector.load %arg18[%c0_35, %c16] : memref<8x32xf32, #tpu.memory_space<vmem>>, vector<8x8xf32>
    tpu.vector_store %arg18[%c0_35, %c16], %75 {strides = array<i32>} : memref<8x32xf32, #tpu.memory_space<vmem>>, vector<8x8xf32>,
    %77 = vector.extract_strided_slice %23 {offsets = [0, 24], sizes = [8, 8], strides = [1, 1]} : vector<8x32xbf16> to vector<8x8xbf16>
    %78 = vector.extract_strided_slice %24 {offsets = [0, 24], sizes = [8, 8], strides = [1, 1]} : vector<8x32xbf16> to vector<8x8xbf16>
    %79 = vector.extract_strided_slice %25 {offsets = [0, 24], sizes = [8, 8], strides = [1, 1]} : vector<8x32xbf16> to vector<8x8xbf16>
    %cst_36 = arith.constant dense<0.000000e+00> : vector<8x8xf32>
    %80 = tpu.matmul %77, %78, %cst_36 {dimension_numbers = #tpu.dot_dimension_numbers<[1], [1], [0], [0], [0, 0, 1, 0], [], []>} : vector<8x8xbf16>, vector<8x8xbf16>, vector<8x8xf32> -> vector<8x8xf32>
    %cst_37 = arith.constant dense<0xFF800000> : vector<8xf32>
    %81 = vector.multi_reduction <maximumf>, %80, %cst_37 [1] : vector<8x8xf32> to vector<8xf32>
    %82 = vector.shape_cast %81 : vector<8xf32> to vector<8x1xf32>
    %83 = vector.broadcast %82 : vector<8x1xf32> to vector<8x8xf32>
    %84 = arith.subf %80, %83 : vector<8x8xf32>
    %85 = math.exp %84 : vector<8x8xf32>
    %cst_38 = arith.constant dense<0.000000e+00> : vector<8xf32>
    %86 = vector.multi_reduction <add>, %85, %cst_38 [1] : vector<8x8xf32> to vector<8xf32>
    %87 = vector.shape_cast %86 : vector<8xf32> to vector<8x1xf32>
    %88 = tpu.reciprocal %87 {approx = true} : vector<8x1xf32> -> vector<8x1xf32>
    %89 = vector.broadcast %88 : vector<8x1xf32> to vector<8x8xf32>
    %90 = arith.mulf %85, %89 : vector<8x8xf32>
    %91 = arith.truncf %90 : vector<8x8xf32> to vector<8x8xbf16>
    %cst_39 = arith.constant dense<0.000000e+00> : vector<8x8xf32>
    %92 = tpu.matmul %91, %79, %cst_39 {dimension_numbers = #tpu.dot_dimension_numbers<[1], [0], [0], [1], [0, 0, 1, 1], [], []>} : vector<8x8xbf16>, vector<8x8xbf16>, vector<8x8xf32> -> vector<8x8xf32>
    %c0_40 = arith.constant 0 : index
    %c24 = arith.constant 24 : index
    %93 = vector.load %arg18[%c0_40, %c24] : memref<8x32xf32, #tpu.memory_space<vmem>>, vector<8x8xf32>
    tpu.vector_store %arg18[%c0_40, %c24], %92 {strides = array<i32>} : memref<8x32xf32, #tpu.memory_space<vmem>>, vector<8x8xf32>,
    %c0_41 = arith.constant 0 : index
    %c0_42 = arith.constant 0 : index
    %94 = vector.load %arg10[%c0_41, %c0_42] : memref<32x8xbf16, #tpu.memory_space<vmem>>, vector<32x8xbf16>
    %cst_43 = arith.constant dense<0.000000e+00> : vector<8x8xf32>
    %95 = tpu.matmul %4, %94, %cst_43 {dimension_numbers = #tpu.dot_dimension_numbers<[1], [0], [0], [1], [0, 0, 1, 1], [], []>} : vector<8x32xbf16>, vector<32x8xbf16>, vector<8x8xf32> -> vector<8x8xf32>
    %c0_44 = arith.constant 0 : index
    %c0_45 = arith.constant 0 : index
    %96 = vector.load %arg11[%c0_44, %c0_45] : memref<1x8xf32, #tpu.memory_space<vmem>>, vector<1x8xf32>
    %97 = vector.broadcast %96 : vector<1x8xf32> to vector<8x8xf32>
    %98 = arith.addf %95, %97 : vector<8x8xf32>
    %cst_46 = arith.constant 0.000000e+00 : f32
    %99 = vector.broadcast %cst_46 : f32 to vector<8x8xf32>
    %100 = arith.maximumf %98, %99 : vector<8x8xf32>
    %101 = arith.truncf %100 : vector<8x8xf32> to vector<8x8xbf16>
    %c0_47 = arith.constant 0 : index
    %c0_48 = arith.constant 0 : index
    %102 = vector.load %arg12[%c0_47, %c0_48] : memref<8x32xbf16, #tpu.memory_space<vmem>>, vector<8x32xbf16>
    %cst_49 = arith.constant dense<0.000000e+00> : vector<8x32xf32>
    %103 = tpu.matmul %101, %102, %cst_49 {dimension_numbers = #tpu.dot_dimension_numbers<[1], [0], [0], [1], [0, 0, 1, 1], [], []>} : vector<8x8xbf16>, vector<8x32xbf16>, vector<8x32xf32> -> vector<8x32xf32>
    %c0_50 = arith.constant 0 : index
    %c0_51 = arith.constant 0 : index
    %104 = vector.load %arg13[%c0_50, %c0_51] : memref<1x32xf32, #tpu.memory_space<vmem>>, vector<1x32xf32>
    %105 = vector.broadcast %104 : vector<1x32xf32> to vector<8x32xf32>
    %106 = arith.addf %103, %105 : vector<8x32xf32>
    %c0_52 = arith.constant 0 : index
    %107 = memref.load %arg16[%c0_52] : memref<3xf32, #tpu.memory_space<smem>>
    %c1 = arith.constant 1 : index
    %108 = memref.load %arg16[%c1] : memref<3xf32, #tpu.memory_space<smem>>
    %c2 = arith.constant 2 : index
    %109 = memref.load %arg16[%c2] : memref<3xf32, #tpu.memory_space<smem>>
    %c0_53 = arith.constant 0 : index
    %c0_54 = arith.constant 0 : index
    %110 = vector.load %arg18[%c0_53, %c0_54] : memref<8x32xf32, #tpu.memory_space<vmem>>, vector<8x32xf32>
    %111 = vector.broadcast %108 : f32 to vector<8x32xf32>
    %112 = arith.mulf %110, %111 : vector<8x32xf32>
    %113 = vector.broadcast %109 : f32 to vector<8x32xf32>
    %114 = arith.addf %112, %113 : vector<8x32xf32>
    %115 = vector.broadcast %107 : f32 to vector<8x32xf32>
    %116 = arith.mulf %106, %115 : vector<8x32xf32>
    %cst_55 = arith.constant 1.000000e+00 : f32
    %117 = vector.broadcast %cst_55 : f32 to vector<8x32xf32>
    %118 = arith.addf %117, %116 : vector<8x32xf32>
    %119 = arith.mulf %114, %118 : vector<8x32xf32>
    %120 = arith.truncf %119 : vector<8x32xf32> to vector<8x32xbf16>
    %c0_56 = arith.constant 0 : index
    %c0_57 = arith.constant 0 : index
    %121 = vector.load %arg14[%c0_56, %c0_57] : memref<32x32xbf16, #tpu.memory_space<vmem>>, vector<32x32xbf16>
    %cst_58 = arith.constant dense<0.000000e+00> : vector<8x32xf32>
    %122 = tpu.matmul %120, %121, %cst_58 {dimension_numbers = #tpu.dot_dimension_numbers<[1], [0], [0], [1], [0, 0, 1, 1], [], []>} : vector<8x32xbf16>, vector<32x32xbf16>, vector<8x32xf32> -> vector<8x32xf32>
    %c0_59 = arith.constant 0 : index
    %c0_60 = arith.constant 0 : index
    %123 = vector.load %arg15[%c0_59, %c0_60] : memref<1x32xf32, #tpu.memory_space<vmem>>, vector<1x32xf32>
    %124 = vector.broadcast %123 : vector<1x32xf32> to vector<8x32xf32>
    %125 = arith.addf %122, %124 : vector<8x32xf32>
    %c0_61 = arith.constant 0 : index
    %c0_62 = arith.constant 0 : index
    %c0_63 = arith.constant 0 : index
    %126 = vector.load %arg17[%c0_61, %c0_62, %c0_63] : memref<1x8x32xf32, #tpu.memory_space<vmem>>, vector<1x8x32xf32>
    %127 = vector.shape_cast %126 : vector<1x8x32xf32> to vector<8x32xf32>
    %128 = vector.shape_cast %125 : vector<8x32xf32> to vector<1x8x32xf32>
    tpu.vector_store %arg17[%c0_61, %c0_62, %c0_63], %128 {strides = array<i32>} : memref<1x8x32xf32, #tpu.memory_space<vmem>>, vector<1x8x32xf32>,
    return
  }
  func.func @transform_0(%arg0: i32, %arg1: i32) -> (i32, i32, i32) {
    %c0_i32 = arith.constant 0 : i32
    %c0_i32_0 = arith.constant 0 : i32
    return %arg0, %arg1, %c0_i32 : i32, i32, i32
  }
  func.func @transform_1(%arg0: i32, %arg1: i32) -> (i32, i32, i32) {
    %c0_i32 = arith.constant 0 : i32
    %c0_i32_0 = arith.constant 0 : i32
    %c0_i32_1 = arith.constant 0 : i32
    return %arg0, %c0_i32, %c0_i32_0 : i32, i32, i32
  }
  func.func @transform_2(%arg0: i32, %arg1: i32) -> (i32, i32) {
    %c0_i32 = arith.constant 0 : i32
    %c0_i32_0 = arith.constant 0 : i32
    %c0_i32_1 = arith.constant 0 : i32
    return %c0_i32, %c0_i32_0 : i32, i32
  }
  func.func @transform_3(%arg0: i32, %arg1: i32) -> (i32, i32) {
    %c0_i32 = arith.constant 0 : i32
    %c0_i32_0 = arith.constant 0 : i32
    %c0_i32_1 = arith.constant 0 : i32
    return %c0_i32, %c0_i32_0 : i32, i32
  }
  func.func @transform_4(%arg0: i32, %arg1: i32) -> (i32, i32) {
    %c0_i32 = arith.constant 0 : i32
    %c0_i32_0 = arith.constant 0 : i32
    %c0_i32_1 = arith.constant 0 : i32
    return %c0_i32, %c0_i32_0 : i32, i32
  }
  func.func @transform_5(%arg0: i32, %arg1: i32) -> (i32, i32) {
    %c0_i32 = arith.constant 0 : i32
    %c0_i32_0 = arith.constant 0 : i32
    %c0_i32_1 = arith.constant 0 : i32
    return %c0_i32, %c0_i32_0 : i32, i32
  }
  func.func @transform_6(%arg0: i32, %arg1: i32) -> (i32, i32) {
    %c0_i32 = arith.constant 0 : i32
    %c0_i32_0 = arith.constant 0 : i32
    %c0_i32_1 = arith.constant 0 : i32
    return %c0_i32, %c0_i32_0 : i32, i32
  }
  func.func @transform_7(%arg0: i32, %arg1: i32) -> (i32, i32) {
    %c0_i32 = arith.constant 0 : i32
    %c0_i32_0 = arith.constant 0 : i32
    %c0_i32_1 = arith.constant 0 : i32
    return %c0_i32, %c0_i32_0 : i32, i32
  }
  func.func @transform_8(%arg0: i32, %arg1: i32) -> (i32, i32) {
    %c0_i32 = arith.constant 0 : i32
    %c0_i32_0 = arith.constant 0 : i32
    %c0_i32_1 = arith.constant 0 : i32
    return %c0_i32, %c0_i32_0 : i32, i32
  }
  func.func @transform_9(%arg0: i32, %arg1: i32) -> (i32, i32) {
    %c0_i32 = arith.constant 0 : i32
    %c0_i32_0 = arith.constant 0 : i32
    %c0_i32_1 = arith.constant 0 : i32
    return %c0_i32, %c0_i32_0 : i32, i32
  }
  func.func @transform_10(%arg0: i32, %arg1: i32) -> (i32, i32) {
    %c0_i32 = arith.constant 0 : i32
    %c0_i32_0 = arith.constant 0 : i32
    %c0_i32_1 = arith.constant 0 : i32
    return %c0_i32, %c0_i32_0 : i32, i32
  }
  func.func @transform_11(%arg0: i32, %arg1: i32) -> (i32, i32) {
    %c0_i32 = arith.constant 0 : i32
    %c0_i32_0 = arith.constant 0 : i32
    %c0_i32_1 = arith.constant 0 : i32
    return %c0_i32, %c0_i32_0 : i32, i32
  }
  func.func @transform_12(%arg0: i32, %arg1: i32) -> (i32, i32) {
    %c0_i32 = arith.constant 0 : i32
    %c0_i32_0 = arith.constant 0 : i32
    %c0_i32_1 = arith.constant 0 : i32
    return %c0_i32, %c0_i32_0 : i32, i32
  }
  func.func @transform_13(%arg0: i32, %arg1: i32) -> (i32, i32) {
    %c0_i32 = arith.constant 0 : i32
    %c0_i32_0 = arith.constant 0 : i32
    %c0_i32_1 = arith.constant 0 : i32
    return %c0_i32, %c0_i32_0 : i32, i32
  }
  func.func @transform_14(%arg0: i32, %arg1: i32) -> i32 {
    %c0_i32 = arith.constant 0 : i32
    %c0_i32_0 = arith.constant 0 : i32
    return %c0_i32 : i32
  }
  func.func @transform_15(%arg0: i32, %arg1: i32) -> (i32, i32, i32) {
    %c0_i32 = arith.constant 0 : i32
    %c0_i32_0 = arith.constant 0 : i32
    return %arg0, %arg1, %c0_i32 : i32, i32, i32
  }
}

</mosaic_0001>

<bundles_post_ra>
// kernel: tpu_custom_call.1
= control target key start
LH: loop header
LB: loop body
LE: loop exit
PB: predicated region body
PF: predicated region fallthrough
CT: control target
= control target key end

     0   :  { %s2784_s0 = inlined_call_operand.vmem [shape: f32[2,8,32], index: 0, kind: input, shape index: {}]   ;;  %s2785_s1 = inlined_call_operand.hbm [shape: f32[2,8,32], index: 1, kind: input, shape index: {}]   ;;  %s2786_s2 = inlined_call_operand.hbm [shape: bf16[32,32], index: 2, kind: input, shape index: {}]   ;;  %s2787_s3 = inlined_call_operand.vmem [shape: f32[1,32], index: 3, kind: input, shape index: {}]   ;;  %s2788_s4 = inlined_call_operand.vmem [shape: bf16[32,32], index: 4, kind: input, shape index: {}]   ;;  %s2789_s5 = inlined_call_operand.vmem [shape: f32[1,32], index: 5, kind: input, shape index: {}]   ;;  %s2790_s6 = inlined_call_operand.hbm [shape: bf16[32,32], index: 6, kind: input, shape index: {}]   ;;  %s2791_s7 = inlined_call_operand.hbm [shape: f32[1,32], index: 7, kind: input, shape index: {}]   ;;  %s2792_s8 = inlined_call_operand.vmem [shape: bf16[32,8], index: 8, kind: input, shape index: {}]   ;;  %s2793_s9 = inlined_call_operand.hbm [shape: f32[1,8], index: 9, kind: input, shape index: {}]   ;;  %s2794_s10 = inlined_call_operand.vmem [shape: bf16[8,32], index: 10, kind: input, shape index: {}]   ;;  %s2795_s11 = inlined_call_operand.vmem [shape: f32[1,32], index: 11, kind: input, shape index: {}]   ;;  %s2796_s12 = inlined_call_operand.vmem [shape: bf16[32,32], index: 12, kind: input, shape index: {}]   ;;  %s2797_s13 = inlined_call_operand.vmem [shape: f32[1,32], index: 13, kind: input, shape index: {}]   ;;  %s2798_s14 = inlined_call_operand.vmem [shape: f32[3], index: 14, kind: input, shape index: {}]   ;;  %s2799_s15 = inlined_call_operand.hbm [shape: f32[2,8,32], index: 15, kind: output, shape index: {}]  }
   0x1   :  { %2808 = sst [smem:[#allocation20_spill]] %s2784_s0 }
   0x2   :  { %2809 = sst [smem:[#allocation21_spill]] %s2786_s2 }
   0x3   :  { %2810 = sst [smem:[#allocation22_spill]] %s2787_s3 }
   0x4   :  { %2811 = sst [smem:[#allocation23_spill]] %s2789_s5 }
   0x5   :  { %2812 = sst [smem:[#allocation24_spill]] %s2792_s8 }
   0x6   :  { %2813 = sst [smem:[#allocation25_spill]] %s2794_s10 }
   0x7   :  { %2814 = sst [smem:[#allocation26_spill]] %s2795_s11 }
   0x8   :  { %2815 = sst [smem:[#allocation27_spill]] %s2796_s12 }
   0x9   :  { %2816 = sst [smem:[#allocation28_spill]] %s2797_s13 }
   0xa   :  { %2817 = sst [smem:[#allocation29_spill]] %s2799_s15 }
   0xb   :  { %20 = vsyncpa [#allocation4], 0 }
   0xc   :  { %22 = vsyncpa [#allocation4 + $0x1], 0 }
   0xd   :  { %23 = vsyncpa [#allocation8], 0 }
   0xe   :  { %24 = vsyncpa [#allocation11], 0 }
   0xf   :  { %25 = vsyncpa [#allocation6], 0 }
  0x10   :  { %26 = vsyncpa [#allocation5], 0 }
  0x11   :  { %28 = vsyncpa [#allocation5 + $0x1], 0  ;;  %s2323_s18 = smov 0   ;;  %s2325_s19 = smov 0  }
  0x12   :  { %s2327_s20 = smov 0   ;;  %s2329_s21 = smov 0  }
  0x13   :  { %s2331_s22 = smov 0   ;;  %s2333_s23 = smov 0  }
  0x14 LB: > { %s2800_s24 = sadd.s32 4294967295, %s2224_s23   ;;  %p1643_p0 = scmp.ge.s32.totalorder %s2224_s23, 1  ;;  %s2224_s23 = sphi %s2333_s23, %s34_s23   ;;  %s2220_s22 = sphi %s2331_s22, %s2848_s22   ;;  %s2216_s21 = sphi %s2329_s21, %s2847_s21   ;;  %s2212_s20 = sphi %s2327_s20, %s2846_s20   ;;  %s2208_s19 = sphi %s2325_s19, %s2845_s19   ;;  %s2204_s18 = sphi %s2323_s18, %s2844_s18  }
  0x15   : > { %p2357_p1 = scmp.eq.s32.totalorder %s2800_s24, 0  ;;  %p406_p2 = scmp.lt.s32.totalorder %s2224_s23, 3 }
  0x16   : > { %s2226_s27 = smov [#allocation7]   ;;  %s2227_s30 = smov [#allocation10]  }
  0x17   : > { %s2818_s25 = scalar_select %p2357_p1, 1, 0 }
  0x18   : > { %p2362_p3 = pnand %p1643_p0, %p406_p2  ;;  %s418_s28 = sshll.u32 %s2226_s27, 4  ;;  %s2366_s28 = int_to_ptr.vmem [resolvable:$true] %s418_s28 }
  0x19   : > { %s454_s16 = sshll.u32 %s2227_s30, 4  ;;  %s2228_s17 = smov [#allocation9]   ;;  %s2377_s16 = int_to_ptr.vmem [resolvable:$true] %s454_s16 }
  0x1a   : > { %s2819_s26 = scalar_select %p2362_p3, 1, 0 }
  0x1b   : > { %p1848_p4 = pneg %p2362_p3  ;;  %s2379_s24 = sshll.u32 %s2228_s17, 4  ;;  %s441_s24 = int_to_ptr.vmem [resolvable:$true] %s2379_s24 }
  0x1c   : > { %s2821_s2 = sld [smem:[#allocation21_spill]] }
  0x1d   : > { %p2373_p6 = pnand %p1848_p4, %p2357_p1 }
  0x1f   : > { %p2389_p8 = pneg %p2373_p6 }
  0x22   : > { %s1973_s13 = scalar_lea.hbm %s2821_s2, 256 }
  0x23   : > { %p1974_p7 = scmp.ne.s32.totalorder %s2821_s2, %s1973_s13  ;;  %p1980_p11 = scmp.lt.u32.totalorder %s1973_s13, %s2821_s2 }
  0x25   : > { %p1976_p9 = pnand %p2389_p8, %p1974_p7 }
  0x27   : > { %p1977_p10 = pneg %p1976_p9 }
  0x29   : > { %p1982_p12 = pnand %p1980_p11, %p1977_p10 }
  0x2b   : > { %1985 = shalt.err (!%p1982_p12)
}
  0x2c   : > { %s1986_s11 = scalar_lea.vmem %s2366_s28, 256  ;;  %p1994_p4 = scmp.lt.s32.totalorder %s2366_s28, %s2366_s28 }
  0x2d   : > { %p1987_p13 = scmp.ne.s32.totalorder %s2366_s28, %s1986_s11  ;;  %p1995_p5 = scmp.lt.s32.totalorder %s1986_s11, %s1986_s11 }
  0x2f   : > { %p1989_p0 = pnand %p1987_p13, %p2389_p8  ;;  %p1996_p7 = por %p1995_p5, %p1994_p4 }
  0x31   : > { %p1990_p2 = pneg %p1989_p0 }
  0x33   : > { %p1997_p9 = pnand %p1996_p7, %p1990_p2 }
  0x35   : > { %2000 = shalt.err (!%p1997_p9)
}
  0x36   : > { %s2229_s12 = smov 64   ;;  %s2230_s13 = smov 4  }
  0x37   : > { %1851 = dma.hbm_to_vmem [thread:$0]  (!%p2373_p6), %s2821_s2, 256, %s2366_s28, [#allocation8], %s2229_s12, %s2229_s12, %s2230_s13  }
  0x38   : > { %s2001_s11 = scalar_lea.hbm %s2791_s7, 16 }
  0x39   : > { %p2002_p5 = scmp.ne.s32.totalorder %s2791_s7, %s2001_s11  ;;  %p2008_p12 = scmp.lt.u32.totalorder %s2001_s11, %s2791_s7 }
  0x3b   : > { %p2004_p10 = pnand %p2002_p5, %p2389_p8 }
  0x3d   : > { %p2005_p11 = pneg %p2004_p10 }
  0x3f   : > { %p2010_p13 = pnand %p2008_p12, %p2005_p11 }
  0x41   : > { %2013 = shalt.err (!%p2010_p13)
}
  0x42   : > { %s2014_s28 = scalar_lea.vmem %s2377_s16, 16  ;;  %s2021_s3 = scalar_lea.vmem %s2377_s16, 32 }
  0x43   : > { %p2015_p0 = scmp.ne.s32.totalorder %s2377_s16, %s2014_s28  ;;  %p2022_p7 = scmp.lt.s32.totalorder %s2377_s16, %s2377_s16 }
  0x44   : > { %p2023_p9 = scmp.lt.s32.totalorder %s2021_s3, %s2014_s28 }
  0x45   : > { %p2017_p2 = pnand %p2015_p0, %p2389_p8 }
  0x46   : > { %p2024_p5 = por %p2023_p9, %p2022_p7 }
  0x47   : > { %p2018_p4 = pneg %p2017_p2 }
  0x49   : > { %p2025_p10 = pnand %p2024_p5, %p2018_p4 }
  0x4b   : > { %2028 = shalt.err (!%p2025_p10)
}
  0x4c   : > { %1857 = dma.hbm_to_vmem [thread:$0]  (!%p2373_p6), %s2791_s7, 16, %s2377_s16, [#allocation11]  }
  0x4d   : > { %s2029_s27 = scalar_lea.hbm %s2790_s6, 256 }
  0x4e   : > { %p2030_p11 = scmp.ne.s32.totalorder %s2790_s6, %s2029_s27  ;;  %p2036_p0 = scmp.lt.u32.totalorder %s2029_s27, %s2790_s6 }
  0x50   : > { %p2032_p12 = pnand %p2030_p11, %p2389_p8 }
  0x52   : > { %p2033_p13 = pneg %p2032_p12 }
  0x54   : > { %p2038_p2 = pnand %p2036_p0, %p2033_p13 }
  0x56   : > { %2041 = shalt.err (!%p2038_p2)
}
  0x57   : > { %s2042_s3 = scalar_lea.vmem %s441_s24, 256  ;;  %p2050_p5 = scmp.lt.s32.totalorder %s441_s24, %s441_s24 }
  0x58   : > { %p2043_p4 = scmp.ne.s32.totalorder %s441_s24, %s2042_s3  ;;  %p2051_p10 = scmp.lt.s32.totalorder %s2042_s3, %s2042_s3 }
  0x5a   : > { %p2045_p7 = pnand %p2043_p4, %p2389_p8  ;;  %p2052_p3 = por %p2051_p10, %p2050_p5 }
  0x5c   : > { %p2046_p9 = pneg %p2045_p7 }
  0x5e   : > { %p2053_p1 = pnand %p2052_p3, %p2046_p9 }
  0x60   : > { %2056 = shalt.err (!%p2053_p1)
}
  0x61   : > { %1854 = dma.hbm_to_vmem [thread:$0]  (!%p2373_p6), %s2790_s6, 256, %s441_s24, [#allocation8], %s2229_s12, %s2229_s12, %s2230_s13  }
  0x62   : > { %s2231_s5 = smov [#allocation12]   ;;  %s491_s30 = sshll.u32 %s2798_s14, 4  ;;  %s2462_s30 = int_to_ptr.vmem [resolvable:$true] %s491_s30 }
  0x63   : > { %s468_s8 = sshll.u32 %s2231_s5, 4  ;;  %s2057_s28 = scalar_lea.hbm %s2793_s9, 16  ;;  %s469_s8 = int_to_ptr.vmem [resolvable:$true] %s468_s8 }
  0x64   : > { %p2058_p1 = scmp.ne.s32.totalorder %s2793_s9, %s2057_s28  ;;  %p2064_p12 = scmp.lt.u32.totalorder %s2057_s28, %s2793_s9 }
  0x66   : > { %p2060_p3 = pnand %p2058_p1, %p2389_p8 }
  0x68   : > { %p2061_p11 = pneg %p2060_p3 }
  0x6a   : > { %p2066_p13 = pnand %p2064_p12, %p2061_p11 }
  0x6c   : > { %2069 = shalt.err (!%p2066_p13)
}
  0x6d   : > { %s2070_s13 = scalar_lea.vmem %s469_s8, 16  ;;  %s2077_s16 = scalar_lea.vmem %s469_s8, 32 }
  0x6e   : > { %p2071_p0 = scmp.ne.s32.totalorder %s469_s8, %s2070_s13  ;;  %p2078_p7 = scmp.lt.s32.totalorder %s469_s8, %s469_s8 }
  0x6f   : > { %p2079_p9 = scmp.lt.s32.totalorder %s2077_s16, %s2070_s13 }
  0x70   : > { %p2073_p2 = pnand %p2071_p0, %p2389_p8 }
  0x71   : > { %p2080_p5 = por %p2079_p9, %p2078_p7 }
  0x72   : > { %p2074_p4 = pneg %p2073_p2 }
  0x74   : > { %p2081_p10 = pnand %p2080_p5, %p2074_p4 }
  0x76   : > { %2084 = shalt.err (!%p2081_p10)
}
  0x77   : > { %1860 = dma.hbm_to_vmem [thread:$0]  (!%p2373_p6), %s2793_s9, 16, %s469_s8, [#allocation11]  }
  0x78   : > { %s2085_s5 = scalar_lea.vmem %s2462_s30, 16  ;;  %p2093_p12 = scmp.lt.s32.totalorder %s2462_s30, %s2462_s30 }
  0x79   : > { %p2086_p1 = scmp.ne.s32.totalorder %s2462_s30, %s2085_s5  ;;  %p2094_p13 = scmp.lt.s32.totalorder %s2085_s5, %s2085_s5 }
  0x7b   : > { %p2088_p3 = pnand %p2086_p1, %p2389_p8  ;;  %p2095_p0 = por %p2094_p13, %p2093_p12 }
  0x7d   : > { %p2089_p11 = pneg %p2088_p3 }
  0x7f   : > { %p2096_p2 = pnand %p2095_p0, %p2089_p11 }
  0x81   : > { %2099 = shalt.err (!%p2096_p2)
}
  0x82   : > { %s2232_s15 = smov [#allocation13]   ;;  %s1642_s10 = sadd.s32 4294967294, %s2224_s23  }
  0x83   : > { %1863 = dma.vmem_to_smem (!%p2373_p6), %s2462_s30, 16, %s2232_s15, [#allocation6]  }
  0x84   : > { %s46_s8 = sadd.s32 1, %s2220_s22  ;;  %s81_s27 = sadd.s32 1, %s2212_s20 }
  0x85   : > { %p48_p8 = scmp.ge.s32.totalorder %s46_s8, 2  ;;  %p88_p4 = scmp.ne.s32.totalorder %s2212_s20, %s2208_s19 }
  0x86   : > { %p89_p7 = scmp.eq.s32.totalorder %s2224_s23, 0  ;;  %p94_p9 = scmp.ne.s32.totalorder %s2208_s19, %s2204_s18 }
  0x87   : > { %s2850_s8 = smov (%p48_p8, %s46_s8), 0  ;;  %p2824_p10 = scmp.ne.s32.totalorder %s2818_s25, 0 }
  0x88   : > { %p2501_p5 = por %p89_p7, %p88_p4  ;;  %s78_s17 = ssub.s32 %s2220_s22, %s2850_s8 }
  0x89   : > { %p2507_p6 = por %p2824_p10, %p94_p9  ;;  %s2826_s11 = sadd.s32 4294967295, %s2224_s23  }
  0x8a   : > { %p393_p1 = scmp.eq.s32.totalorder %s2826_s11, 1  ;;  %p79_p3 = scmp.eq.s32.totalorder %s78_s17, 0 }
  0x8b   : > { %p399_p11 = scmp.eq.s32.totalorder %s1642_s10, 1  ;;  %p1877_p13 = scmp.lt.s32.totalorder %s2224_s23, 2 }
  0x8c   : > { %p2515_p12 = por %p393_p1, %p88_p4  ;;  %s512_s12 = sand.u32 1, %s2212_s20  }
  0x8d   : > { %s2521_s3 = scalar_select %p79_p3, %s2212_s20, %s81_s27  }
  0x8e   : > { %s2827_s28 = scalar_select %p2515_p12, 1, 0 }
  0x8f   : > { %p2523_p0 = por %p399_p11, %p94_p9  ;;  %s1650_s13 = sshll.u32 %s512_s12, 3 }
  0x90   : > { %s1651_s16 = sshll.u32 %s2220_s22, 7  ;;  %s516_s15 = scalar_lea.vmem [#allocation3], %s1650_s13 }
  0x91   : > { %s2828_s24 = scalar_select %p2523_p0, 1, 0 }
  0x92   : > { %s2532_s5 = scalar_lea.hbm %s2785_s1, %s1651_s16  ;;  %s523_s10 = sshll.u32 %s516_s15, 4  ;;  %s2534_s10 = int_to_ptr.vmem [resolvable:$true] %s523_s10 }
  0x93   : > { %p2538_p2 = pnand %p1877_p13, %p2501_p5  ;;  %s513_s17 = scalar_lea.sflag [#allocation4], %s512_s12 }
  0x94   : > { %s2100_s11 = scalar_lea.hbm %s2532_s5, 128  ;;  %s2105_s2 = scalar_lea.hbm %s2785_s1, 256 }
  0x95   : > { %p2101_p8 = scmp.ne.s32.totalorder %s2532_s5, %s2100_s11  ;;  %p2102_p4 = pneg %p2538_p2 }
  0x96   : > { %p2106_p5 = scmp.lt.u32.totalorder %s2532_s5, %s2785_s1  ;;  %p2107_p10 = scmp.lt.u32.totalorder %s2105_s2, %s2100_s11 }
  0x97   : > { %p2103_p7 = pnand %p2102_p4, %p2101_p8  ;;  %p2109_p3 = scmp.lt.u32.totalorder %s2100_s11, %s2532_s5 }
  0x98   : > { %p2108_p1 = por %p2107_p10, %p2106_p5 }
  0x99   : > { %p2104_p9 = pneg %p2103_p7 }
  0x9a   : > { %p2110_p11 = por %p2109_p3, %p2108_p1 }
  0x9c   : > { %p2111_p13 = pnand %p2110_p11, %p2104_p9 }
  0x9e   : > { %2114 = shalt.err (!%p2111_p13)
}
  0x9f   : > { %s2115_s12 = scalar_lea.vmem %s2534_s10, 128  ;;  %s2233_s15 = smov [#allocation3]  }
  0xa0   : > { %p2116_p8 = scmp.ne.s32.totalorder %s2534_s10, %s2115_s12  ;;  %s2120_s13 = sshll.u32 %s2233_s15, 4  ;;  %s2121_s13 = int_to_ptr.vmem [resolvable:$false] %s2120_s13 }
  0xa1   : > { %s2122_s16 = scalar_lea.vmem %s2121_s13, 256  ;;  %p2123_p12 = scmp.lt.s32.totalorder %s2534_s10, %s2121_s13 }
  0xa2   : > { %p2118_p7 = pnand %p2116_p8, %p2102_p4  ;;  %p2124_p5 = scmp.lt.s32.totalorder %s2122_s16, %s2115_s12 }
  0xa4   : > { %p2119_p0 = pneg %p2118_p7  ;;  %p2125_p10 = por %p2124_p5, %p2123_p12 }
  0xa6   : > { %p2126_p1 = pnand %p2125_p10, %p2119_p0 }
  0xa8   : > { %2129 = shalt.err (!%p2126_p1)
}
  0xa9   : > { %1867 = dma.hbm_to_vmem [thread:$0]  (!%p2538_p2), %s2532_s5, 128, %s2534_s10, %s513_s17  }
  0xaa   : > { %p2830_p9 = scmp.ne.s32.totalorder %s2819_s26, 0 }
  0xab   : > { %s2570_s11 = sand.u32 (!%p2830_p9), 1, %s2208_s19  }
  0xac   : > { %532 = sbr.rel (%p2830_p9) target bundleno = 1653 (0x675), region = 80  ;;  %s1653_s2 = sshll.u32 (!%p2830_p9), %s2570_s11, 3 }
  0xad   : > { %s535_s29 = scalar_lea.sflag (!%p2830_p9), [#allocation4], %s2570_s11  ;;  %s538_s0 = scalar_lea.vmem (!%p2830_p9), [#allocation3], %s1653_s2 }
  0xb3   : > { %2183 = dma.done.wait (%p2507_p6), %s535_s29, 128  }
  0xb4   : > { %2185 = vsyncadd (%p2507_p6), %s535_s29, 4294967168  ;;  %p2831_p12 = scmp.ne.s32.totalorder %s2818_s25, 0 }
  0xb6   : > { %2187 = dma.done.wait (%p2831_p12), [#allocation8], 512  }
  0xb7   : > { %2189 = vsyncadd (%p2831_p12), [#allocation8], 4294966784 }
  0xb8   : > { %2191 = dma.done.wait (%p2831_p12), [#allocation11], 32  }
  0xb9   : > { %2193 = vsyncadd (%p2831_p12), [#allocation11], 4294967264 }
  0xba   : > { %2195 = dma.done.wait (%p2831_p12), [#allocation6], 16  }
  0xbb   : > { %2197 = vsyncadd (%p2831_p12), [#allocation6], 4294967280 }
  0xbc   : > { %563 = sfence }
  0xbd   : > { %v1947_v0 = vld [vmem:[%s2788_s4] sm:$0xff]   ;;  %v2234_v1 = vmov 0.0   ;;  %v1948_v2 = vld [vmem:[#allocation7] sm:$0xff]   ;;  %v1949_v3 = vld [vmem:[%s2788_s4 + $0x8] sm:$0xff]   ;;  %vm2235_vm0 = vmmov 0   ;;  %p613_p6 = scmp.lt.s32.totalorder %s2216_s21, 1 }
  0xbe   : > { %1738 = vmatprep.subr.bf16.mxu1 %v2234_v1  ;;  %1730 = vmatprep.subr.bf16.mxu0 %v2234_v1  ;;  %v1950_v4 = vld [vmem:[#allocation7 + $0x8] sm:$0xff]   ;;  %v622_v5 = vld [vmem:[%s538_s0] sm:$0xff]  ;;  %vm648_vm1 = vcmask 261120   ;;  %s2832_s15 = sld [smem:[#allocation20_spill]]  ;;  %s2833_s0 = sld [smem:[#allocation23_spill]]  ;;  %vm825_vm2 = vcmask 64512  }
  0xbf   : > { %1739 = vmatpush3.bf16.msra.mxu1 %v1947_v0  ;;  %1742 = vmatprep.mubr.msk.bf16.mxu1 %vm2235_vm0, %v2234_v1  ;;  %v624_v6 = vpack.c.bf16 %v622_v5, %v622_v5  ;;  %s614_s25 = scalar_select %p613_p6, %s2216_s21, 1  ;;  %v1951_v25 = vld [vmem:[#allocation9] sm:$0xff]   ;;  %v1952_v26 = vld [vmem:[#allocation9 + $0x8] sm:$0xff]   ;;  %v1669_v41 = vld [vmem:[#allocation10] ss:$0 sm:$0xff]  ;;  %vm887_vm3 = vcmask 1043456  }
  0xc0   : > { %1731 = vmatpush3.bf16.msra.mxu0 %v1948_v2  ;;  %1740 = vmatprep.subr.bf16.mxu1 %v2234_v1  ;;  %s2834_s5 = sld [smem:[#allocation22_spill]]  ;;  %s2236_s10 = smov 112   ;;  %vm1049_vm4 = vcmask 130112   ;;  %vm1165_vm5 = vcmask 195712   ;;  %vm1281_vm6 = vcmask 261312  }
  0xc1   : > { %1732 = vmatprep.subr.bf16.mxu0 %v2234_v1  ;;  %1734 = vmatprep.mubr.msk.bf16.mxu0 %vm2235_vm0, %v2234_v1  ;;  %s1660_s27 = sshll.u32 %s614_s25, 3  ;;  %s2237_s25 = smov 120  }
  0xc2   : > { %s2836_s26 = sld [smem:[#allocation25_spill]]  ;;  %s2239_s30 = smov 8  }
  0xc3   : > { %1741 = vmatpush3.bf16.msra.mxu1 %v1949_v3  ;;  %s1402_s16 = sld [smem:[#allocation13]]  ;;  %s2839_s17 = sld [smem:[#allocation28_spill]] }
  0xc4   : > { %1733 = vmatpush3.bf16.msra.mxu0 %v1950_v4  ;;  %1754 = vmatprep.subr.bf16.mxu1 %v2234_v1  ;;  %s619_s13 = scalar_lea.vmem %s2832_s15, %s1660_s27  ;;  %v1665_v9 = vld [vmem:[%s2833_s0] ss:$0 sm:$0xff]  ;;  %s2238_s27 = smov 104  }
  0xc5   : > { %1746 = vmatprep.subr.bf16.mxu0 %v2234_v1  ;;  %v621_v7 = vld [vmem:[%s619_s13] sm:$0xff]  ;;  %s2835_s15 = sld [smem:[#allocation24_spill]]  ;;  %s2241_s13 = smov 24  }
  0xc6   : > { %1743 = vmatmul.mubr.msk.bf16.vlgmr.msra.gmra.mrb[0].mxu1 %vm648_vm1, %v624_v6  ;;  %v2614_v8 = vpack.c.bf16 %v621_v7, %v621_v7  ;;  %v1661_v13 = vld [vmem:[%s2834_s5] ss:$0 sm:$0xff]  ;;  %s2240_s5 = smov 16   ;;  %s1694_s12 = sshll.u32 %s2216_s21, 7 }
  0xc7   : > { %1756 = vmatprep.mubr.msk.bf16.mxu1 %vm2235_vm0, %v2234_v1  ;;  %s1483_s21 = scalar_lea.sflag [#allocation5], %s2570_s11  ;;  %p2841_p2 = scmp.ne.s32.totalorder %s2827_s28, 0 }
  0xc8   : > { %1735 = vmatmul.mubr.msk.bf16.vlgmr.msra.gmra.mrb[0].mxu0 %vm648_vm1, %v2614_v8 }
  0xc9   : > { %1750 = vmatprep.mubr.msk.bf16.mxu0 %vm2235_vm0, %v2234_v1  ;;  %1747 = vmatpush3.bf16.msra.mxu0 %v1951_v25 }
  0xca   : > { %1748 = vmatprep.subr.bf16.mxu0 %v2234_v1 }
  0xcb   : > { %v1954_v7 = vld [vmem:[%s2835_s15 + $0x8] sm:$0xff]  }
  0xcd   : > { %1749 = vmatpush3.bf16.msra.mxu0 %v1952_v26 }
  0xce   : > { %1760 = vmatprep.subr.bf16.mxu0 %v2234_v1 }
  0xd0   : > { %1751 = vmatmul.mubr.msk.bf16.vlgmr.msra.gmra.mrb[4].mxu0 %vm648_vm1, %v624_v6  ;;  %v1953_v6 = vld [vmem:[%s2835_s15] sm:$0xff]  }
  0xd1   : > { %1762 = vmatprep.mubr.msk.bf16.mxu0 %vm2235_vm0, %v2234_v1 }
 0x199   : > { %v753_v10 = vpop.f32.mrb[0].mxu1 }
 0x19a   : > { %v754_v11 = vadd.f32 %v1665_v9, %v753_v10  ;;  %v1744_v12 = vpop.f32.mrb[1].mxu1 }
 0x19b   : > { %v756_v14 = vpop.f32.mrb[2].mxu1  ;;  %v686_v16 = vpop.f32.mrb[0].mxu0 }
 0x19c   : > { %v823_v15 = vpack.c.bf16 %v754_v11, %v754_v11  ;;  %v1745_v17 = vpop.f32.mrb[3].mxu1  ;;  %v687_v18 = vadd.f32 %v1661_v13, %v686_v16  ;;  %v1736_v19 = vpop.f32.mrb[1].mxu0 }
 0x19d   : > { %v689_v20 = vpop.f32.mrb[2].mxu0 }
 0x19e   : > { %1053 = vrot.lane.b32.xlu1 %v823_v15, %s2236_s10  ;;  %936 = vrot.lane.b32.xlu0 %v823_v15, %s2237_s25  ;;  %v830_v21 = vsel %vm825_vm2, %v823_v15, 0  ;;  %v692_v22 = vmul.f32 0.35355338, %v687_v18  ;;  %v1737_v23 = vpop.f32.mrb[3].mxu0 }
 0x19f   : > { %1755 = vmatpush3.bf16.xpose.msra.mxu1 %v830_v21 }
 0x1a0   : > { %1766 = vmatprep.subr.bf16.mxu1 %v2234_v1  ;;  %v822_v24 = vpack.c.bf16 %v692_v22, %v692_v22 }
 0x1a2   : > { %1051 = vrot.lane.b32.xlu1 %v822_v24, %s2236_s10  ;;  %933 = vrot.lane.b32.xlu0 %v822_v24, %s2237_s25 }
 0x1a3   : > { %v816_v42 = vpop.f32.mrb[4].mxu0 }
 0x1a4   : > { %v817_v43 = vadd.f32 %v1669_v41, %v816_v42  ;;  %v1752_v44 = vpop.f32.mrb[5].mxu0 }
 0x1a5   : > { %v819_v45 = vpop.f32.mrb[6].mxu0 }
 0x1a6   : > { %1757 = vmatmul.mubr.msk.bf16.vlgmr.msra.gmra.mrb[4].mxu1 %vm825_vm2, %v822_v24  ;;  %1167 = vrot.lane.b32.xlu1 %v822_v24, %s2238_s27  ;;  %v2660_v46 = vpack.c.bf16 %v817_v43, %v817_v43  ;;  %v1753_v47 = vpop.f32.mrb[7].mxu0 }
 0x1a7   : > { %1169 = vrot.lane.b32.xlu0 %v823_v15, %s2238_s27  ;;  %1768 = vmatprep.mubr.msk.bf16.mxu1 %vm2235_vm0, %v2234_v1 }
 0x1a8   : > { %v889_v48 = vsel %vm887_vm3, %v2660_v46, 0 }
 0x1a9   : > { %1761 = vmatpush3.bf16.msra.mxu0 %v889_v48 }
 0x1aa   : > { %1772 = vmatprep.subr.bf16.mxu0 %v2234_v1 }
 0x210   : > { %v937_v27 = vpop.permute.xlu0 %936  ;;  %v1054_v29 = vpop.permute.xlu1 %1053 }
 0x211   : > { %v942_v28 = vsel %vm825_vm2, %v937_v27, 0  ;;  %v1059_v31 = vsel %vm825_vm2, %v1054_v29, 0 }
 0x212   : > { %1767 = vmatpush3.bf16.xpose.msra.mxu1 %v942_v28 }
 0x213   : > { %1778 = vmatprep.subr.bf16.mxu1 %v2234_v1 }
 0x214   : > { %v934_v30 = vpop.permute.xlu0 %933  ;;  %v1052_v33 = vpop.permute.xlu1 %1051 }
 0x218   : > { %v1168_v35 = vpop.permute.xlu1 %1167 }
 0x219   : > { %1769 = vmatmul.mubr.msk.bf16.vlgmr.msra.gmra.mrb[8].mxu1 %vm825_vm2, %v934_v30  ;;  %v1170_v32 = vpop.permute.xlu0 %1169 }
 0x21a   : > { %1779 = vmatpush3.bf16.xpose.msra.mxu1 %v1059_v31  ;;  %1780 = vmatprep.mubr.msk.bf16.mxu1 %vm2235_vm0, %v2234_v1  ;;  %v1175_v34 = vsel %vm825_vm2, %v1170_v32, 0 }
 0x21b   : > { %1790 = vmatprep.subr.bf16.mxu1 %v2234_v1 }
 0x221   : > { %1781 = vmatmul.mubr.msk.bf16.vlgmr.msra.gmra.mrb[12].mxu1 %vm825_vm2, %v1052_v33 }
 0x222   : > { %1791 = vmatpush3.bf16.xpose.msra.mxu1 %v1175_v34  ;;  %1792 = vmatprep.mubr.msk.bf16.mxu1 %vm2235_vm0, %v2234_v1 }
 0x223   : > { %1802 = vmatprep.subr.bf16.mxu1 %v2234_v1 }
 0x229   : > { %1793 = vmatmul.mubr.msk.bf16.vlgmr.msra.gmra.mrb[16].mxu1 %vm825_vm2, %v1168_v35 }
 0x22a   : > { %1806 = vmatprep.mubr.msk.bf16.mxu1 %vm2235_vm0, %v2234_v1  ;;  %1803 = vmatpush3.bf16.msra.mxu1 %v1953_v6 }
 0x22b   : > { %1804 = vmatprep.subr.bf16.mxu1 %v2234_v1 }
 0x22e   : > { %1805 = vmatpush3.bf16.msra.mxu1 %v1954_v7 }
 0x22f   : > { %1816 = vmatprep.subr.bf16.mxu1 %v2234_v1 }
 0x231   : > { %1807 = vmatmul.mubr.msk.bf16.vlgmr.msra.gmra.mrb[20].mxu1 %vm648_vm1, %v2614_v8 }
 0x232   : > { %1820 = vmatprep.mubr.msk.bf16.mxu1 %vm2235_vm0, %v2234_v1 }
 0x279   : > { %v866_v36 = vpop.f32.mrb[4].mxu1 }
 0x27a   : > { %v1758_v37 = vpop.f32.mrb[5].mxu1  ;;  %v872_v38 = vsel %vm825_vm2, %v866_v36, -inf }
 0x27b   : > { %873 = vmax.xlane.f32.xlu0 %v872_v38  ;;  %v869_v39 = vpop.f32.mrb[6].mxu1 }
 0x27c   : > { %v1759_v40 = vpop.f32.mrb[7].mxu1 }
 0x2ec   : > { %v978_v49 = vpop.f32.mrb[8].mxu1 }
 0x2ed   : > { %v1770_v50 = vpop.f32.mrb[9].mxu1  ;;  %v984_v51 = vsel %vm825_vm2, %v978_v49, -inf }
 0x2ee   : > { %985 = vmax.xlane.f32.xlu1 %v984_v51  ;;  %v981_v52 = vpop.f32.mrb[10].mxu1 }
 0x2ef   : > { %v1771_v53 = vpop.f32.mrb[11].mxu1 }
 0x2f4   : > { %v1095_v54 = vpop.f32.mrb[12].mxu1 }
 0x2f5   : > { %v1782_v55 = vpop.f32.mrb[13].mxu1  ;;  %v1101_v56 = vsel %vm825_vm2, %v1095_v54, -inf }
 0x2f6   : > { %1102 = vmax.xlane.f32.xlu0 %v1101_v56  ;;  %v1098_v57 = vpop.f32.mrb[14].mxu1 }
 0x2f7   : > { %v1783_v58 = vpop.f32.mrb[15].mxu1 }
 0x2fc   : > { %v1211_v59 = vpop.f32.mrb[16].mxu1 }
 0x2fd   : > { %v1794_v60 = vpop.f32.mrb[17].mxu1  ;;  %v1217_v61 = vsel %vm825_vm2, %v1211_v59, -inf }
 0x2fe   : > { %1218 = vmax.xlane.f32.xlu0 %v1217_v61  ;;  %v1214_v62 = vpop.f32.mrb[18].mxu1 }
 0x2ff   : > { %v1795_v63 = vpop.f32.mrb[19].mxu1 }
 0x304   : > { %v1340_v29 = vpop.f32.mrb[20].mxu1 }
 0x305   : > { %v1808_v30 = vpop.f32.mrb[21].mxu1 }
 0x306   : > { %v1343_v31 = vpop.f32.mrb[22].mxu1 }
 0x307   : > { %v1809_v32 = vpop.f32.mrb[23].mxu1 }
 0x308   : > { %v874_v0 = vpop.xlane.xlu0 %873 }
 0x309   : > { %v875_v2 = vsub.f32 %v866_v36, %v874_v0 }
 0x30b   : > { %v876_v3 = vmul.f32 1.442695, %v875_v2 }
 0x30d   : > { %1957 = vpow2.f32 %v876_v3 }
 0x317   : > { %v1958_v4 = vpop.eup %1957 }
 0x318   : > { %v878_v5 = vsel %vm825_vm2, %v1958_v4, 0.0 }
 0x319   : > { %879 = vadd.xlane.f32.xlu1 %v878_v5 }
 0x32a   : > { %997 = vrot.lane.b32.xlu1 %v2660_v46, %s2237_s25 }
 0x37b   : > { %v986_v9 = vpop.xlane.xlu1 %985 }
 0x37c   : > { %v987_v10 = vsub.f32 %v978_v49, %v986_v9  ;;  %v1348_v49 = vld [vmem:[%s2836_s26] sm:$0xf]  ;;  %s2838_s26 = sld [smem:[#allocation26_spill]] }
 0x37d   : > { %v1360_v52 = vsel %vm887_vm3, %v1348_v49, 0 }
 0x37e   : > { %v988_v11 = vmul.f32 1.442695, %v987_v10 }
 0x380   : > { %1959 = vpow2.f32 %v988_v11 }
 0x383   : > { %v1103_v12 = vpop.xlane.xlu0 %1102 }
 0x384   : > { %v1104_v13 = vsub.f32 %v1095_v54, %v1103_v12 }
 0x386   : > { %v1105_v14 = vmul.f32 1.442695, %v1104_v13 }
 0x388   : > { %1961 = vpow2.f32 %v1105_v14 }
 0x38a   : > { %v1960_v15 = vpop.eup %1959 }
 0x38b   : > { %v1219_v16 = vpop.xlane.xlu0 %1218  ;;  %v990_v17 = vsel %vm825_vm2, %v1960_v15, 0.0 }
 0x38c   : > { %v1220_v18 = vsub.f32 %v1211_v59, %v1219_v16  ;;  %991 = vadd.xlane.f32.xlu0 %v990_v17  ;;  %v1685_v16 = vld [vmem:[%s2838_s26] ss:$0 sm:$0xff]  ;;  %s2840_s26 = sld [smem:[#allocation29_spill]] }
 0x38e   : > { %v1221_v19 = vmul.f32 1.442695, %v1220_v18 }
 0x390   : > { %1963 = vpow2.f32 %v1221_v19  ;;  %v1410_v19 = vstv %s1402_s16 }
 0x392   : > { %v1962_v8 = vpop.eup %1961 }
 0x393   : > { %v1107_v20 = vsel %vm825_vm2, %v1962_v8, 0.0 }
 0x394   : > { %1108 = vadd.xlane.f32.xlu1 %v1107_v20 }
 0x39a   : > { %v1964_v21 = vpop.eup %1963 }
 0x39b   : > { %v1223_v22 = vsel %vm825_vm2, %v1964_v21, 0.0 }
 0x39c   : > { %1224 = vadd.xlane.f32.xlu0 %v1223_v22 }
 0x3a5   : > { %1229 = vrot.lane.b32.xlu1 %v2660_v46, %s2238_s27  ;;  %s2837_s27 = sld [smem:[#allocation27_spill]] }
 0x3a6   : > { %v880_v23 = vpop.xlane.xlu1 %879 }
 0x3a7   : > { %1965 = vrcp.f32 %v880_v23 }
 0x3aa   : > { %v998_v25 = vpop.permute.xlu1 %997 }
 0x3ab   : > { %v1003_v28 = vsel %vm887_vm3, %v998_v25, 0  ;;  %v1956_v6 = vld [vmem:[%s2837_s27 + $0x8] sm:$0xff]  }
 0x3b1   : > { %v1966_v24 = vpop.eup %1965 }
 0x3b2   : > { %v882_v26 = vmul.f32 %v1966_v24, %v1958_v4  ;;  %1113 = vrot.lane.b32.xlu0 %v2660_v46, %s2236_s10  ;;  %v1681_v46 = vld [vmem:[#allocation12] ss:$0 sm:$0xff]  ;;  %v1955_v4 = vld [vmem:[%s2837_s27] sm:$0xff]  }
 0x3b3   : > { %v1341_v50 = vadd.f32 %v1681_v46, %v1340_v29  ;;  %1817 = vmatpush3.bf16.msra.mxu1 %v1955_v4 }
 0x3b4   : > { %v883_v27 = vpack.c.bf16 %v882_v26, %v882_v26  ;;  %1818 = vmatprep.subr.bf16.mxu1 %v2234_v1 }
 0x3b5   : > { %v1346_v53 = vmax.f32 %v1341_v50, 0.0 }
 0x3b6   : > { %1763 = vmatmul.mubr.msk.bf16.vlgmr.msra.gmra.mrb[8].mxu0 %vm825_vm2, %v883_v27 }
 0x3b7   : > { %1773 = vmatpush3.bf16.msra.mxu0 %v1003_v28  ;;  %1774 = vmatprep.mubr.msk.bf16.mxu0 %vm2235_vm0, %v2234_v1  ;;  %v1347_v54 = vpack.c.bf16 %v1346_v53, %v1346_v53  ;;  %v1689_v28 = vld [vmem:[%s2839_s17] ss:$0 sm:$0xff] }
 0x3b8   : > { %1784 = vmatprep.subr.bf16.mxu0 %v2234_v1  ;;  %1819 = vmatpush3.bf16.msra.mxu1 %v1956_v6 }
 0x419   : > { %v992_v33 = vpop.xlane.xlu0 %991 }
 0x41a   : > { %1967 = vrcp.f32 %v992_v33 }
 0x421   : > { %v1109_v34 = vpop.xlane.xlu1 %1108 }
 0x422   : > { %1969 = vrcp.f32 %v1109_v34 }
 0x424   : > { %v1968_v35 = vpop.eup %1967 }
 0x425   : > { %v994_v36 = vmul.f32 %v1968_v35, %v1960_v15  ;;  %v1230_v43 = vpop.permute.xlu1 %1229 }
 0x426   : > { %v1235_v45 = vsel %vm887_vm3, %v1230_v43, 0 }
 0x427   : > { %v995_v37 = vpack.c.bf16 %v994_v36, %v994_v36 }
 0x429   : > { %v1225_v38 = vpop.xlane.xlu0 %1224  ;;  %1775 = vmatmul.mubr.msk.bf16.vlgmr.msra.gmra.mrb[12].mxu0 %vm825_vm2, %v995_v37 }
 0x42a   : > { %1971 = vrcp.f32 %v1225_v38  ;;  %1786 = vmatprep.mubr.msk.bf16.mxu0 %vm2235_vm0, %v2234_v1 }
 0x42c   : > { %v1970_v39 = vpop.eup %1969 }
 0x42d   : > { %v1111_v40 = vmul.f32 %v1970_v39, %v1962_v8  ;;  %v1114_v41 = vpop.permute.xlu0 %1113 }
 0x42e   : > { %v1119_v42 = vsel %vm887_vm3, %v1114_v41, 0 }
 0x42f   : > { %1785 = vmatpush3.bf16.msra.mxu0 %v1119_v42  ;;  %v1112_v44 = vpack.c.bf16 %v1111_v40, %v1111_v40 }
 0x430   : > { %1796 = vmatprep.subr.bf16.mxu0 %v2234_v1 }
 0x432   : > { %1787 = vmatmul.mubr.msk.bf16.vlgmr.msra.gmra.mrb[16].mxu0 %vm825_vm2, %v1112_v44 }
 0x433   : > { %1797 = vmatpush3.bf16.msra.mxu0 %v1235_v45  ;;  %1798 = vmatprep.mubr.msk.bf16.mxu0 %vm2235_vm0, %v2234_v1 }
 0x434   : > { %v1972_v47 = vpop.eup %1971  ;;  %1810 = vmatprep.subr.bf16.mxu0 %v2234_v1 }
 0x435   : > { %v1227_v48 = vmul.f32 %v1972_v47, %v1964_v21 }
 0x437   : > { %v1228_v51 = vpack.c.bf16 %v1227_v48, %v1227_v48 }
 0x43a   : > { %1799 = vmatmul.mubr.msk.bf16.vlgmr.msra.gmra.mrb[20].mxu0 %vm825_vm2, %v1228_v51 }
 0x43b   : > { %1811 = vmatpush3.bf16.msra.mxu0 %v1360_v52  ;;  %1812 = vmatprep.mubr.msk.bf16.mxu0 %vm2235_vm0, %v2234_v1 }
 0x442   : > { %1813 = vmatmul.mubr.msk.bf16.vlgmr.msra.gmra.mrb[24].mxu0 %vm825_vm2, %v1347_v54 }
 0x489   : > { %v925_v55 = vpop.f32.mrb[8].mxu0 }
 0x48a   : > { %931 = vst.msk [vmem:[#allocation2] sm:$0xff] %vm825_vm2, %v925_v55  ;;  %v1764_v56 = vpop.f32.mrb[9].mxu0 }
 0x48b   : > { %v928_v57 = vpop.f32.mrb[10].mxu0 }
 0x48c   : > { %v1765_v58 = vpop.f32.mrb[11].mxu0 }
 0x4fc   : > { %v1039_v59 = vpop.f32.mrb[12].mxu0 }
 0x4fd   : > { %1046 = vrot.lane.b32.xlu1 %v1039_v59, %s2239_s30  ;;  %v1776_v60 = vpop.f32.mrb[13].mxu0  ;;  %s1687_s30 = sld [smem:[#allocation13 + $0x1]] }
 0x4fe   : > { %v1042_v61 = vpop.f32.mrb[14].mxu0 }
 0x4ff   : > { %v1777_v62 = vpop.f32.mrb[15].mxu0 }
 0x503   : > { %v1406_v20 = vstv %s1687_s30  ;;  %s2734_s30 = scalar_lea.hbm %s2840_s26, %s1694_s12 }
 0x505   : > { %v1155_v63 = vpop.f32.mrb[16].mxu0 }
 0x506   : > { %1162 = vrot.lane.b32.xlu0 %v1155_v63, %s2240_s5  ;;  %v1788_v0 = vpop.f32.mrb[17].mxu0  ;;  %s1688_s5 = sld [smem:[#allocation13 + $0x2]] }
 0x507   : > { %v1158_v2 = vpop.f32.mrb[18].mxu0 }
 0x508   : > { %v1789_v3 = vpop.f32.mrb[19].mxu0 }
 0x50c   : > { %v1408_v22 = vstv %s1688_s5  ;;  %s2242_s5 = smov [#allocation14]  }
 0x50d   : > { %v1271_v5 = vpop.f32.mrb[20].mxu0  ;;  %s2134_s10 = sshll.u32 %s2242_s5, 4  ;;  %s2135_s10 = int_to_ptr.vmem [resolvable:$false] %s2134_s10 }
 0x50e   : > { %1278 = vrot.lane.b32.xlu1 %v1271_v5, %s2241_s13  ;;  %v1800_v7 = vpop.f32.mrb[21].mxu0  ;;  %s612_s13 = scalar_lea.vmem [#allocation14], %s1653_s2  ;;  %s2136_s25 = scalar_lea.vmem %s2135_s10, 256 }
 0x50f   : > { %v1274_v9 = vpop.f32.mrb[22].mxu0  ;;  %s1497_s16 = sshll.u32 %s612_s13, 4  ;;  %s2736_s16 = int_to_ptr.vmem [resolvable:$true] %s1497_s16 }
 0x510   : > { %v1801_v10 = vpop.f32.mrb[23].mxu0  ;;  %s2130_s2 = scalar_lea.vmem %s2736_s16, 128  ;;  %p2137_p11 = scmp.lt.s32.totalorder %s2736_s16, %s2135_s10 }
 0x511   : > { %p2131_p0 = scmp.ne.s32.totalorder %s2736_s16, %s2130_s2  ;;  %p2138_p13 = scmp.lt.s32.totalorder %s2136_s25, %s2130_s2 }
 0x513   : > { %p2132_p4 = pnand %p2131_p0, %p2841_p2  ;;  %p2139_p8 = por %p2138_p13, %p2137_p11 }
 0x515   : > { %v1396_v11 = vpop.f32.mrb[24].mxu0  ;;  %p2133_p3 = pneg %p2132_p4 }
 0x516   : > { %v1814_v12 = vpop.f32.mrb[25].mxu0  ;;  %v1397_v18 = vadd.f32 %v1685_v16, %v1396_v11 }
 0x517   : > { %v1399_v13 = vpop.f32.mrb[26].mxu0  ;;  %p2140_p7 = pnand %p2139_p8, %p2133_p3 }
 0x518   : > { %v1815_v14 = vpop.f32.mrb[27].mxu0  ;;  %v1411_v8 = vmul.f32 %v1410_v19, %v1397_v18 }
 0x51a   : > { %v1412_v24 = vadd.f32 1.0, %v1411_v8 }
 0x56f   : > { %v1047_v15 = vpop.permute.xlu1 %1046 }
 0x570   : > { %1050 = vst.msk [vmem:[#allocation2] sm:$0xff] %vm1049_vm4, %v1047_v15 }
 0x578   : > { %v1163_v1 = vpop.permute.xlu0 %1162 }
 0x579   : > { %1166 = vst.msk [vmem:[#allocation2] sm:$0xff] %vm1165_vm5, %v1163_v1 }
 0x580   : > { %v1279_v17 = vpop.permute.xlu1 %1278 }
 0x581   : > { %1282 = vst.msk [vmem:[#allocation2] sm:$0xff] %vm1281_vm6, %v1279_v17 }
 0x588   : > { %v1405_v21 = vld [vmem:[#allocation2] sm:$0xff] }
 0x589   : > { %v1407_v23 = vmul.f32 %v1406_v20, %v1405_v21 }
 0x58b   : > { %v1409_v25 = vadd.f32 %v1408_v22, %v1407_v23 }
 0x58d   : > { %v1413_v26 = vmul.f32 %v1412_v24, %v1409_v25 }
 0x58f   : > { %v1414_v27 = vpack.c.bf16 %v1413_v26, %v1413_v26 }
 0x591   : > { %1821 = vmatmul.mubr.msk.bf16.vlgmr.msra.gmra.mrb[24].mxu1 %vm648_vm1, %v1414_v27 }
 0x664   : > { %v1475_v29 = vpop.f32.mrb[24].mxu1 }
 0x665   : > { %v1476_v30 = vadd.f32 %v1689_v28, %v1475_v29  ;;  %v1822_v31 = vpop.f32.mrb[25].mxu1 }
 0x666   : > { %v1478_v32 = vpop.f32.mrb[26].mxu1 }
 0x667   : > { %v1823_v33 = vpop.f32.mrb[27].mxu1  ;;  %1481 = vst.msk [vmem:[%s612_s13] sm:$0xff] %vm648_vm1, %v1476_v30 }
 0x668   : > { %2143 = shalt.err (!%p2140_p7)
}
 0x669   : > { %s2144_s11 = scalar_lea.hbm %s2734_s30, 128  ;;  %s2148_s13 = scalar_lea.hbm %s2840_s26, 256 }
 0x66a   : > { %p2145_p5 = scmp.ne.s32.totalorder %s2734_s30, %s2144_s11  ;;  %p2149_p9 = scmp.lt.u32.totalorder %s2734_s30, %s2840_s26 }
 0x66b   : > { %p2150_p12 = scmp.lt.u32.totalorder %s2148_s13, %s2144_s11  ;;  %p2152_p0 = scmp.lt.u32.totalorder %s2144_s11, %s2734_s30 }
 0x66c   : > { %p2146_p10 = pnand %p2145_p5, %p2841_p2 }
 0x66d   : > { %p2151_p6 = por %p2150_p12, %p2149_p9 }
 0x66e   : > { %p2147_p1 = pneg %p2146_p10 }
 0x66f   : > { %p2153_p4 = por %p2152_p0, %p2151_p6 }
 0x671   : > { %p2154_p3 = pnand %p2153_p4, %p2147_p1 }
 0x673   : > { %2157 = shalt.err (!%p2154_p3)
}
 0x674   : > { %1846 = dma.vmem_to_hbm [thread:$0]  (%p2841_p2), %s2736_s16, 128, %s2734_s30, %s1483_s21  }
 0x675 PF: > { %s1509_s2 = sand.u32 1, %s2204_s18   ;;  %p2842_p11 = scmp.ne.s32.totalorder %s2828_s24, 0 }
 0x676   : > { %p2843_p13 = scmp.ge.s32.totalorder %s2224_s23, 2  ;;  %s1510_s5 = scalar_lea.sflag [#allocation5], %s1509_s2 }
 0x678   : > { %p1869_p8 = pnand %p2843_p13, %p2842_p11 }
 0x67a   : > { %2199 = dma.done.wait (!%p1869_p8), %s1510_s5, 128  }
 0x67b   : > { %2201 = vsyncadd (!%p1869_p8), %s1510_s5, 4294967168  ;;  %s34_s23 = sadd.s32 1, %s2224_s23   ;;  %s2844_s18 = smov %s2208_s19 }
 0x67c   : > { %p31_p7 = scmp.ge.s32.totalorder %s34_s23, 4   ;;  %s2845_s19 = smov %s2212_s20 }
 0x67d   : > { %s2846_s20 = smov %s2521_s3  ;;  %s2847_s21 = smov %s2220_s22 }
 0x67e   : > { %s2848_s22 = smov %s2850_s8  ;;  %33 = sbr.rel (!%p31_p7) target bundleno = 20 (0x14), region = 149 }
 0x685   :  { %1515 = vsyncpa [#allocation4], 1 }
 0x686   :  { %1517 = vsyncpa [#allocation4 + $0x1], 1 }
 0x687   :  { %1518 = vsyncpa [#allocation8], 1 }
 0x688   :  { %1519 = vsyncpa [#allocation11], 1 }
 0x689   :  { %1520 = vsyncpa [#allocation5], 1 }
 0x68a   :  { %1522 = vsyncpa [#allocation5 + $0x1], 1 }
 0x68b   :  { %1523 = vsyncpa [#allocation6], 1 }
 0x68c   :  { %1525 = vsyncpa [#allocation6 + $0x1], 1 }

</bundles_post_ra>
